<compile_context>
chip_gen: v6e
topology: v6e:2x2x1
jax: 0.10.0
libtpu: 0.0.40
codegen_flags: <defaults>
</compile_context>

<pallas_src>
import math
import functools

import jax
import jax.numpy as jnp
from jax.experimental import pallas as pl
from jax.experimental.pallas import tpu as pltpu


def _gnn_kernel(
    a_in_ref,     # (Bt, N, N)
    a_out_ref,    # (Bt, N, N)
    h_ref,        # (Bt, N, H)
    wt_ein_ref,   # (H, H)  linear_edge_in.weight.T
    b_ein_ref,    # (1, H)
    wt_eout_ref,  # (H, H)  linear_edge_out.weight.T
    b_eout_ref,   # (1, H)
    wt_ih_in_r_ref, wt_ih_in_i_ref, wt_ih_in_n_ref,      # (H, H) each
    wt_ih_out_r_ref, wt_ih_out_i_ref, wt_ih_out_n_ref,   # (H, H) each
    wt_hh_r_ref, wt_hh_i_ref, wt_hh_n_ref,               # (H, H) each
    b_ih_r_ref, b_ih_i_ref, b_ih_n_ref,                  # (1, H) each
    b_hh_r_ref, b_hh_i_ref, b_hh_n_ref,                  # (1, H) each
    b_iah_ref,    # (1, H)
    b_oah_ref,    # (1, H)
    o_ref,        # (Bt, N, H)
    *,
    n_nodes: int,
    hidden_size: int,
    batch_tile: int,
    step: int,
    matmul_dtype,
):
    N, H, Bt = n_nodes, hidden_size, batch_tile
    M = Bt * N

    # Grid-/step-invariant operands: load (and cast) once, reuse across steps.
    a_in = a_in_ref[...].astype(matmul_dtype)     # (Bt, N, N)
    a_out = a_out_ref[...].astype(matmul_dtype)   # (Bt, N, N)

    wt_ein = wt_ein_ref[...].astype(matmul_dtype)
    wt_eout = wt_eout_ref[...].astype(matmul_dtype)
    w_in_r = wt_ih_in_r_ref[...].astype(matmul_dtype)
    w_in_i = wt_ih_in_i_ref[...].astype(matmul_dtype)
    w_in_n = wt_ih_in_n_ref[...].astype(matmul_dtype)
    w_out_r = wt_ih_out_r_ref[...].astype(matmul_dtype)
    w_out_i = wt_ih_out_i_ref[...].astype(matmul_dtype)
    w_out_n = wt_ih_out_n_ref[...].astype(matmul_dtype)
    w_hh_r = wt_hh_r_ref[...].astype(matmul_dtype)
    w_hh_i = wt_hh_i_ref[...].astype(matmul_dtype)
    w_hh_n = wt_hh_n_ref[...].astype(matmul_dtype)

    b_ein = b_ein_ref[...]
    b_eout = b_eout_ref[...]
    b_ih_r = b_ih_r_ref[...]
    b_ih_i = b_ih_i_ref[...]
    b_ih_n = b_ih_n_ref[...]
    b_hh_r = b_hh_r_ref[...]
    b_hh_i = b_hh_i_ref[...]
    b_hh_n = b_hh_n_ref[...]
    b_iah = b_iah_ref[...]
    b_oah = b_oah_ref[...]

    def mm(x, w):  # batch-folded (M, H) x (H, H) matmul, f32 accumulate
        return jnp.dot(x.astype(matmul_dtype), w, preferred_element_type=jnp.float32)

    h = h_ref[...].astype(jnp.float32)            # (Bt, N, H)

    # step is small & static -> unrolled; hidden stays VMEM-resident.
    for _ in range(step):
        h2 = h.reshape(M, H)                      # fold batch into the M dim

        # edge linears (pre-transposed weights -> no in-kernel .T)
        edge_in = mm(h2, wt_ein) + b_ein          # (M, H)
        edge_out = mm(h2, wt_eout) + b_eout       # (M, H)

        # per-graph adjacency aggregation
        input_in = jnp.einsum(
            "bij,bjh->bih", a_in, edge_in.reshape(Bt, N, H).astype(matmul_dtype),
            preferred_element_type=jnp.float32)   # (Bt, N, H)
        input_out = jnp.einsum(
            "bij,bjh->bih", a_out, edge_out.reshape(Bt, N, H).astype(matmul_dtype),
            preferred_element_type=jnp.float32)

        ii = input_in.reshape(M, H) + b_iah       # (M, H)
        io = input_out.reshape(M, H) + b_oah      # (M, H)

        # gate projections; weights pre-split per (in/out half, r/i/n gate)
        # so there is no lane-axis concat and no lane slicing of g_i / g_h.
        i_r = mm(ii, w_in_r) + mm(io, w_out_r) + b_ih_r
        i_i = mm(ii, w_in_i) + mm(io, w_out_i) + b_ih_i
        i_n = mm(ii, w_in_n) + mm(io, w_out_n) + b_ih_n
        h_r = mm(h2, w_hh_r) + b_hh_r
        h_i = mm(h2, w_hh_i) + b_hh_i
        h_n = mm(h2, w_hh_n) + b_hh_n

        resetgate = jax.nn.sigmoid(i_r + h_r)
        inputgate = jax.nn.sigmoid(i_i + h_i)
        newgate = jnp.tanh(i_n + resetgate * h_n)
        hy = newgate + inputgate * (h2 - newgate)  # (M, H)

        h = hy.reshape(Bt, N, H)

    o_ref[...] = h.astype(o_ref.dtype)


def _pick_batch_tile(B, max_tile=8):
    bt = min(B, max_tile)
    while B % bt != 0:
        bt -= 1
    return bt


def gnn_forward(A, hidden, params, step=1, matmul_dtype=jnp.float32,
                max_batch_tile=8):
    """GNN.forward: `step` applications of GNN_cell, fused into one kernel.

    A: [B, N, 2N] f32, hidden: [B, N, H] f32.
    matmul_dtype: set to jnp.bfloat16 on v6e/v7x for ~2x MXU throughput
    (gate math stays f32); default f32 for exact parity with the reference.
    """
    B, N, twoN = A.shape
    assert twoN == 2 * N, "A must be [B, N, 2N]"
    H = hidden.shape[-1]

    Bt = _pick_batch_tile(B, max_batch_tile)

    # ---- wrapper-side layout prep (one-time, outside the kernel) ----------
    a_in = A[:, :, :N]
    a_out = A[:, :, N:2 * N]

    wt_ih = params["w_ih"].T          # (2H, 3H)
    wt_hh = params["w_hh"].T          # (H, 3H)
    b_ih = params["b_ih"].reshape(1, 3 * H)
    b_hh = params["b_hh"].reshape(1, 3 * H)

    def col(w, g):                    # r/i/n gate column block
        return w[:, g * H:(g + 1) * H]

    kernel_params = [
        params["w_edge_in"].T,   params["b_edge_in"].reshape(1, H),
        params["w_edge_out"].T,  params["b_edge_out"].reshape(1, H),
        col(wt_ih[:H], 0), col(wt_ih[:H], 1), col(wt_ih[:H], 2),      # in-half
        col(wt_ih[H:], 0), col(wt_ih[H:], 1), col(wt_ih[H:], 2),      # out-half
        col(wt_hh, 0), col(wt_hh, 1), col(wt_hh, 2),
        col(b_ih, 0), col(b_ih, 1), col(b_ih, 2),
        col(b_hh, 0), col(b_hh, 1), col(b_hh, 2),
        params["b_iah"].reshape(1, H), params["b_oah"].reshape(1, H),
    ]

    kernel = functools.partial(
        _gnn_kernel, n_nodes=N, hidden_size=H, batch_tile=Bt, step=step,
        matmul_dtype=matmul_dtype)

    # Grid-invariant param specs. (Double-buffering these tiny constants
    # wastes a few KiB of VMEM only; pipeline_mode=pl.Buffered(1) could
    # reclaim it on v7x if the A tile ever gets large.)
    def param_spec(arr):
        return pl.BlockSpec(arr.shape, lambda b: (0, 0))

    n_param_elems = sum(int(p.size) for p in kernel_params)
    flops = 2 * step * B * (11 * N * H * H + 2 * N * N * H)
    transcendentals = step * B * N * 3 * H
    bytes_accessed = 4 * (2 * B * N * N + 2 * B * N * H + n_param_elems)

    return pl.pallas_call(
        kernel,
        out_shape=jax.ShapeDtypeStruct((B, N, H), hidden.dtype),
        grid_spec=pltpu.PrefetchScalarGridSpec(
            num_scalar_prefetch=0,
            grid=(B // Bt,),
            in_specs=[
                pl.BlockSpec((Bt, N, N), lambda b: (b, 0, 0)),   # A_in
                pl.BlockSpec((Bt, N, N), lambda b: (b, 0, 0)),   # A_out
                pl.BlockSpec((Bt, N, H), lambda b: (b, 0, 0)),   # hidden
            ] + [param_spec(p) for p in kernel_params],
            out_specs=pl.BlockSpec((Bt, N, H), lambda b: (b, 0, 0)),
        ),
        compiler_params=pltpu.CompilerParams(
            dimension_semantics=("parallel",),
        ),
        cost_estimate=pl.CostEstimate(
            flops=flops,
            transcendentals=transcendentals,
            bytes_accessed=bytes_accessed,
        ),
    )(a_in, a_out, hidden, *kernel_params)


def init_params(key, hidden_size):
    """Deterministic init, uniform(-stdv, stdv) like SR-GNN reset_parameters."""
    H = hidden_size
    stdv = 1.0 / math.sqrt(H)
    keys = jax.random.split(key, 12)
    u = lambda k, shape: jax.random.uniform(k, shape, jnp.float32, -stdv, stdv)
    return {
        "w_ih":       u(keys[0], (3 * H, 2 * H)),
        "w_hh":       u(keys[1], (3 * H, H)),
        "b_ih":       u(keys[2], (1, 3 * H)),
        "b_hh":       u(keys[3], (1, 3 * H)),
        "b_iah":      u(keys[4], (1, H)),
        "b_oah":      u(keys[5], (1, H)),
        "w_edge_in":  u(keys[6], (H, H)),
        "b_edge_in":  u(keys[7], (1, H)),
        "w_edge_out": u(keys[8], (H, H)),
        "b_edge_out": u(keys[9], (1, H)),
        # linear_edge_f is declared in __init__ but unused in forward; init for parity.
        "w_edge_f":   u(keys[10], (H, H)),
        "b_edge_f":   u(keys[11], (1, H)),
    }


def gnn_reference(A, hidden, params, step=1):
    """Pure-JAX reference mirroring the PyTorch forward, for validation."""
    N = A.shape[1]
    for _ in range(step):
        edge_in = hidden @ params["w_edge_in"].T + params["b_edge_in"][0]
        edge_out = hidden @ params["w_edge_out"].T + params["b_edge_out"][0]
        input_in = jnp.matmul(A[:, :, :N], edge_in) + params["b_iah"][0]
        input_out = jnp.matmul(A[:, :, N:2 * N], edge_out) + params["b_oah"][0]
        inputs = jnp.concatenate([input_in, input_out], axis=2)
        g_i = inputs @ params["w_ih"].T + params["b_ih"][0]
        g_h = hidden @ params["w_hh"].T + params["b_hh"][0]
        i_r, i_i, i_n = jnp.split(g_i, 3, axis=2)
        h_r, h_i, h_n = jnp.split(g_h, 3, axis=2)
        resetgate = jax.nn.sigmoid(i_r + h_r)
        inputgate = jax.nn.sigmoid(i_i + h_i)
        newgate = jnp.tanh(i_n + resetgate * h_n)
        hidden = newgate + inputgate * (hidden - newgate)
    return hidden


if __name__ == "__main__":
    key = jax.random.PRNGKey(0)
    k_a, k_h, k_p = jax.random.split(key, 3)

    ok = True
    for (B, N, H, step) in [(2, 8, 32, 1), (4, 8, 32, 3)]:
        A = jax.random.uniform(k_a, (B, N, 2 * N), jnp.float32)
        hidden = jax.random.normal(k_h, (B, N, H), jnp.float32)
        params = init_params(k_p, H)

        out = gnn_forward(A, hidden, params, step=step)
        out = jax.block_until_ready(out)

        ref = gnn_reference(A, hidden, params, step=step)
        ok &= out.shape == (B, N, H)
        ok &= bool(jnp.allclose(out, ref, atol=1e-5, rtol=1e-5))

    assert ok, "mismatch vs reference"
    print("KERNEL_OK")
</pallas_src>

<mosaic_0001>
module attributes {stable_mosaic.version = 11 : i64} {
  func.func @_gnn_kernel(%arg0: i32, %arg1: memref<2x8x8xf32, #tpu.memory_space<vmem>>, %arg2: memref<2x8x8xf32, #tpu.memory_space<vmem>>, %arg3: memref<2x8x32xf32, #tpu.memory_space<vmem>>, %arg4: memref<32x32xf32, #tpu.memory_space<vmem>>, %arg5: memref<1x32xf32, #tpu.memory_space<vmem>>, %arg6: memref<32x32xf32, #tpu.memory_space<vmem>>, %arg7: memref<1x32xf32, #tpu.memory_space<vmem>>, %arg8: memref<32x32xf32, #tpu.memory_space<vmem>>, %arg9: memref<32x32xf32, #tpu.memory_space<vmem>>, %arg10: memref<32x32xf32, #tpu.memory_space<vmem>>, %arg11: memref<32x32xf32, #tpu.memory_space<vmem>>, %arg12: memref<32x32xf32, #tpu.memory_space<vmem>>, %arg13: memref<32x32xf32, #tpu.memory_space<vmem>>, %arg14: memref<32x32xf32, #tpu.memory_space<vmem>>, %arg15: memref<32x32xf32, #tpu.memory_space<vmem>>, %arg16: memref<32x32xf32, #tpu.memory_space<vmem>>, %arg17: memref<1x32xf32, #tpu.memory_space<vmem>>, %arg18: memref<1x32xf32, #tpu.memory_space<vmem>>, %arg19: memref<1x32xf32, #tpu.memory_space<vmem>>, %arg20: memref<1x32xf32, #tpu.memory_space<vmem>>, %arg21: memref<1x32xf32, #tpu.memory_space<vmem>>, %arg22: memref<1x32xf32, #tpu.memory_space<vmem>>, %arg23: memref<1x32xf32, #tpu.memory_space<vmem>>, %arg24: memref<1x32xf32, #tpu.memory_space<vmem>>, %arg25: memref<2x8x32xf32, #tpu.memory_space<vmem>>) attributes {dimension_semantics = [#tpu.dimension_semantics<parallel>], iteration_bounds = array<i64: 1>, scalar_prefetch = 0 : i64, scratch_operands = 0 : i64, tpu.core_type = #tpu.core_type<tc>, window_params = [{transform_indices = @transform_0, window_bounds = array<i64: 2, 8, 8>}, {transform_indices = @transform_1, window_bounds = array<i64: 2, 8, 8>}, {transform_indices = @transform_2, window_bounds = array<i64: 2, 8, 32>}, {pipeline_mode = #tpu.pipeline_mode<synchronous>, transform_indices = @transform_3, window_bounds = array<i64: 32, 32>}, {pipeline_mode = #tpu.pipeline_mode<synchronous>, transform_indices = @transform_4, window_bounds = array<i64: 1, 32>}, {pipeline_mode = #tpu.pipeline_mode<synchronous>, transform_indices = @transform_5, window_bounds = array<i64: 32, 32>}, {pipeline_mode = #tpu.pipeline_mode<synchronous>, transform_indices = @transform_6, window_bounds = array<i64: 1, 32>}, {pipeline_mode = #tpu.pipeline_mode<synchronous>, transform_indices = @transform_7, window_bounds = array<i64: 32, 32>}, {pipeline_mode = #tpu.pipeline_mode<synchronous>, transform_indices = @transform_8, window_bounds = array<i64: 32, 32>}, {pipeline_mode = #tpu.pipeline_mode<synchronous>, transform_indices = @transform_9, window_bounds = array<i64: 32, 32>}, {pipeline_mode = #tpu.pipeline_mode<synchronous>, transform_indices = @transform_10, window_bounds = array<i64: 32, 32>}, {pipeline_mode = #tpu.pipeline_mode<synchronous>, transform_indices = @transform_11, window_bounds = array<i64: 32, 32>}, {pipeline_mode = #tpu.pipeline_mode<synchronous>, transform_indices = @transform_12, window_bounds = array<i64: 32, 32>}, {pipeline_mode = #tpu.pipeline_mode<synchronous>, transform_indices = @transform_13, window_bounds = array<i64: 32, 32>}, {pipeline_mode = #tpu.pipeline_mode<synchronous>, transform_indices = @transform_14, window_bounds = array<i64: 32, 32>}, {pipeline_mode = #tpu.pipeline_mode<synchronous>, transform_indices = @transform_15, window_bounds = array<i64: 32, 32>}, {pipeline_mode = #tpu.pipeline_mode<synchronous>, transform_indices = @transform_16, window_bounds = array<i64: 1, 32>}, {pipeline_mode = #tpu.pipeline_mode<synchronous>, transform_indices = @transform_17, window_bounds = array<i64: 1, 32>}, {pipeline_mode = #tpu.pipeline_mode<synchronous>, transform_indices = @transform_18, window_bounds = array<i64: 1, 32>}, {pipeline_mode = #tpu.pipeline_mode<synchronous>, transform_indices = @transform_19, window_bounds = array<i64: 1, 32>}, {pipeline_mode = #tpu.pipeline_mode<synchronous>, transform_indices = @transform_20, window_bounds = array<i64: 1, 32>}, {pipeline_mode = #tpu.pipeline_mode<synchronous>, transform_indices = @transform_21, window_bounds = array<i64: 1, 32>}, {pipeline_mode = #tpu.pipeline_mode<synchronous>, transform_indices = @transform_22, window_bounds = array<i64: 1, 32>}, {pipeline_mode = #tpu.pipeline_mode<synchronous>, transform_indices = @transform_23, window_bounds = array<i64: 1, 32>}, {transform_indices = @transform_24, window_bounds = array<i64: 2, 8, 32>}]} {
    %c0 = arith.constant 0 : index
    %c0_0 = arith.constant 0 : index
    %c0_1 = arith.constant 0 : index
    %0 = vector.load %arg1[%c0, %c0_0, %c0_1] : memref<2x8x8xf32, #tpu.memory_space<vmem>>, vector<2x8x8xf32>
    %c0_2 = arith.constant 0 : index
    %c0_3 = arith.constant 0 : index
    %c0_4 = arith.constant 0 : index
    %1 = vector.load %arg2[%c0_2, %c0_3, %c0_4] : memref<2x8x8xf32, #tpu.memory_space<vmem>>, vector<2x8x8xf32>
    %c0_5 = arith.constant 0 : index
    %c0_6 = arith.constant 0 : index
    %2 = vector.load %arg4[%c0_5, %c0_6] : memref<32x32xf32, #tpu.memory_space<vmem>>, vector<32x32xf32>
    %c0_7 = arith.constant 0 : index
    %c0_8 = arith.constant 0 : index
    %3 = vector.load %arg6[%c0_7, %c0_8] : memref<32x32xf32, #tpu.memory_space<vmem>>, vector<32x32xf32>
    %c0_9 = arith.constant 0 : index
    %c0_10 = arith.constant 0 : index
    %4 = vector.load %arg8[%c0_9, %c0_10] : memref<32x32xf32, #tpu.memory_space<vmem>>, vector<32x32xf32>
    %c0_11 = arith.constant 0 : index
    %c0_12 = arith.constant 0 : index
    %5 = vector.load %arg9[%c0_11, %c0_12] : memref<32x32xf32, #tpu.memory_space<vmem>>, vector<32x32xf32>
    %c0_13 = arith.constant 0 : index
    %c0_14 = arith.constant 0 : index
    %6 = vector.load %arg10[%c0_13, %c0_14] : memref<32x32xf32, #tpu.memory_space<vmem>>, vector<32x32xf32>
    %c0_15 = arith.constant 0 : index
    %c0_16 = arith.constant 0 : index
    %7 = vector.load %arg11[%c0_15, %c0_16] : memref<32x32xf32, #tpu.memory_space<vmem>>, vector<32x32xf32>
    %c0_17 = arith.constant 0 : index
    %c0_18 = arith.constant 0 : index
    %8 = vector.load %arg12[%c0_17, %c0_18] : memref<32x32xf32, #tpu.memory_space<vmem>>, vector<32x32xf32>
    %c0_19 = arith.constant 0 : index
    %c0_20 = arith.constant 0 : index
    %9 = vector.load %arg13[%c0_19, %c0_20] : memref<32x32xf32, #tpu.memory_space<vmem>>, vector<32x32xf32>
    %c0_21 = arith.constant 0 : index
    %c0_22 = arith.constant 0 : index
    %10 = vector.load %arg14[%c0_21, %c0_22] : memref<32x32xf32, #tpu.memory_space<vmem>>, vector<32x32xf32>
    %c0_23 = arith.constant 0 : index
    %c0_24 = arith.constant 0 : index
    %11 = vector.load %arg15[%c0_23, %c0_24] : memref<32x32xf32, #tpu.memory_space<vmem>>, vector<32x32xf32>
    %c0_25 = arith.constant 0 : index
    %c0_26 = arith.constant 0 : index
    %12 = vector.load %arg16[%c0_25, %c0_26] : memref<32x32xf32, #tpu.memory_space<vmem>>, vector<32x32xf32>
    %c0_27 = arith.constant 0 : index
    %c0_28 = arith.constant 0 : index
    %13 = vector.load %arg5[%c0_27, %c0_28] : memref<1x32xf32, #tpu.memory_space<vmem>>, vector<1x32xf32>
    %c0_29 = arith.constant 0 : index
    %c0_30 = arith.constant 0 : index
    %14 = vector.load %arg7[%c0_29, %c0_30] : memref<1x32xf32, #tpu.memory_space<vmem>>, vector<1x32xf32>
    %c0_31 = arith.constant 0 : index
    %c0_32 = arith.constant 0 : index
    %15 = vector.load %arg17[%c0_31, %c0_32] : memref<1x32xf32, #tpu.memory_space<vmem>>, vector<1x32xf32>
    %c0_33 = arith.constant 0 : index
    %c0_34 = arith.constant 0 : index
    %16 = vector.load %arg18[%c0_33, %c0_34] : memref<1x32xf32, #tpu.memory_space<vmem>>, vector<1x32xf32>
    %c0_35 = arith.constant 0 : index
    %c0_36 = arith.constant 0 : index
    %17 = vector.load %arg19[%c0_35, %c0_36] : memref<1x32xf32, #tpu.memory_space<vmem>>, vector<1x32xf32>
    %c0_37 = arith.constant 0 : index
    %c0_38 = arith.constant 0 : index
    %18 = vector.load %arg20[%c0_37, %c0_38] : memref<1x32xf32, #tpu.memory_space<vmem>>, vector<1x32xf32>
    %c0_39 = arith.constant 0 : index
    %c0_40 = arith.constant 0 : index
    %19 = vector.load %arg21[%c0_39, %c0_40] : memref<1x32xf32, #tpu.memory_space<vmem>>, vector<1x32xf32>
    %c0_41 = arith.constant 0 : index
    %c0_42 = arith.constant 0 : index
    %20 = vector.load %arg22[%c0_41, %c0_42] : memref<1x32xf32, #tpu.memory_space<vmem>>, vector<1x32xf32>
    %c0_43 = arith.constant 0 : index
    %c0_44 = arith.constant 0 : index
    %21 = vector.load %arg23[%c0_43, %c0_44] : memref<1x32xf32, #tpu.memory_space<vmem>>, vector<1x32xf32>
    %c0_45 = arith.constant 0 : index
    %c0_46 = arith.constant 0 : index
    %22 = vector.load %arg24[%c0_45, %c0_46] : memref<1x32xf32, #tpu.memory_space<vmem>>, vector<1x32xf32>
    %c0_47 = arith.constant 0 : index
    %c0_48 = arith.constant 0 : index
    %c0_49 = arith.constant 0 : index
    %23 = vector.load %arg3[%c0_47, %c0_48, %c0_49] : memref<2x8x32xf32, #tpu.memory_space<vmem>>, vector<2x8x32xf32>
    %24 = vector.shape_cast %23 : vector<2x8x32xf32> to vector<16x32xf32>
    %cst = arith.constant dense<0.000000e+00> : vector<16x32xf32>
    %25 = tpu.matmul %24, %2, %cst {dimension_numbers = #tpu.dot_dimension_numbers<[1], [0], [0], [1], [0, 0, 1, 1], [], []>} : vector<16x32xf32>, vector<32x32xf32>, vector<16x32xf32> -> vector<16x32xf32>
    %26 = vector.broadcast %13 : vector<1x32xf32> to vector<16x32xf32>
    %27 = arith.addf %25, %26 : vector<16x32xf32>
    %cst_50 = arith.constant dense<0.000000e+00> : vector<16x32xf32>
    %28 = tpu.matmul %24, %3, %cst_50 {dimension_numbers = #tpu.dot_dimension_numbers<[1], [0], [0], [1], [0, 0, 1, 1], [], []>} : vector<16x32xf32>, vector<32x32xf32>, vector<16x32xf32> -> vector<16x32xf32>
    %29 = vector.broadcast %14 : vector<1x32xf32> to vector<16x32xf32>
    %30 = arith.addf %28, %29 : vector<16x32xf32>
    %31 = vector.shape_cast %27 : vector<16x32xf32> to vector<2x8x32xf32>
    "tpu.trace_start"() <{level = 10 : i32, message = "bij,bjh->bih"}> : () -> ()
    %cst_51 = arith.constant dense<0.000000e+00> : vector<2x8x32xf32>
    %32 = tpu.matmul %0, %31, %cst_51 {dimension_numbers = #tpu.dot_dimension_numbers<[2], [1], [1], [2], [0, 0, 0, 1, 1, 2], [0], [0]>} : vector<2x8x8xf32>, vector<2x8x32xf32>, vector<2x8x32xf32> -> vector<2x8x32xf32>
    "tpu.trace_stop"() : () -> ()
    %33 = vector.shape_cast %30 : vector<16x32xf32> to vector<2x8x32xf32>
    "tpu.trace_start"() <{level = 10 : i32, message = "bij,bjh->bih"}> : () -> ()
    %cst_52 = arith.constant dense<0.000000e+00> : vector<2x8x32xf32>
    %34 = tpu.matmul %1, %33, %cst_52 {dimension_numbers = #tpu.dot_dimension_numbers<[2], [1], [1], [2], [0, 0, 0, 1, 1, 2], [0], [0]>} : vector<2x8x8xf32>, vector<2x8x32xf32>, vector<2x8x32xf32> -> vector<2x8x32xf32>
    "tpu.trace_stop"() : () -> ()
    %35 = vector.shape_cast %32 : vector<2x8x32xf32> to vector<16x32xf32>
    %36 = vector.broadcast %21 : vector<1x32xf32> to vector<16x32xf32>
    %37 = arith.addf %35, %36 : vector<16x32xf32>
    %38 = vector.shape_cast %34 : vector<2x8x32xf32> to vector<16x32xf32>
    %39 = vector.broadcast %22 : vector<1x32xf32> to vector<16x32xf32>
    %40 = arith.addf %38, %39 : vector<16x32xf32>
    %cst_53 = arith.constant dense<0.000000e+00> : vector<16x32xf32>
    %41 = tpu.matmul %37, %4, %cst_53 {dimension_numbers = #tpu.dot_dimension_numbers<[1], [0], [0], [1], [0, 0, 1, 1], [], []>} : vector<16x32xf32>, vector<32x32xf32>, vector<16x32xf32> -> vector<16x32xf32>
    %cst_54 = arith.constant dense<0.000000e+00> : vector<16x32xf32>
    %42 = tpu.matmul %40, %7, %cst_54 {dimension_numbers = #tpu.dot_dimension_numbers<[1], [0], [0], [1], [0, 0, 1, 1], [], []>} : vector<16x32xf32>, vector<32x32xf32>, vector<16x32xf32> -> vector<16x32xf32>
    %43 = arith.addf %41, %42 : vector<16x32xf32>
    %44 = vector.broadcast %15 : vector<1x32xf32> to vector<16x32xf32>
    %45 = arith.addf %43, %44 : vector<16x32xf32>
    %cst_55 = arith.constant dense<0.000000e+00> : vector<16x32xf32>
    %46 = tpu.matmul %37, %5, %cst_55 {dimension_numbers = #tpu.dot_dimension_numbers<[1], [0], [0], [1], [0, 0, 1, 1], [], []>} : vector<16x32xf32>, vector<32x32xf32>, vector<16x32xf32> -> vector<16x32xf32>
    %cst_56 = arith.constant dense<0.000000e+00> : vector<16x32xf32>
    %47 = tpu.matmul %40, %8, %cst_56 {dimension_numbers = #tpu.dot_dimension_numbers<[1], [0], [0], [1], [0, 0, 1, 1], [], []>} : vector<16x32xf32>, vector<32x32xf32>, vector<16x32xf32> -> vector<16x32xf32>
    %48 = arith.addf %46, %47 : vector<16x32xf32>
    %49 = vector.broadcast %16 : vector<1x32xf32> to vector<16x32xf32>
    %50 = arith.addf %48, %49 : vector<16x32xf32>
    %cst_57 = arith.constant dense<0.000000e+00> : vector<16x32xf32>
    %51 = tpu.matmul %37, %6, %cst_57 {dimension_numbers = #tpu.dot_dimension_numbers<[1], [0], [0], [1], [0, 0, 1, 1], [], []>} : vector<16x32xf32>, vector<32x32xf32>, vector<16x32xf32> -> vector<16x32xf32>
    %cst_58 = arith.constant dense<0.000000e+00> : vector<16x32xf32>
    %52 = tpu.matmul %40, %9, %cst_58 {dimension_numbers = #tpu.dot_dimension_numbers<[1], [0], [0], [1], [0, 0, 1, 1], [], []>} : vector<16x32xf32>, vector<32x32xf32>, vector<16x32xf32> -> vector<16x32xf32>
    %53 = arith.addf %51, %52 : vector<16x32xf32>
    %54 = vector.broadcast %17 : vector<1x32xf32> to vector<16x32xf32>
    %55 = arith.addf %53, %54 : vector<16x32xf32>
    %cst_59 = arith.constant dense<0.000000e+00> : vector<16x32xf32>
    %56 = tpu.matmul %24, %10, %cst_59 {dimension_numbers = #tpu.dot_dimension_numbers<[1], [0], [0], [1], [0, 0, 1, 1], [], []>} : vector<16x32xf32>, vector<32x32xf32>, vector<16x32xf32> -> vector<16x32xf32>
    %57 = vector.broadcast %18 : vector<1x32xf32> to vector<16x32xf32>
    %58 = arith.addf %56, %57 : vector<16x32xf32>
    %cst_60 = arith.constant dense<0.000000e+00> : vector<16x32xf32>
    %59 = tpu.matmul %24, %11, %cst_60 {dimension_numbers = #tpu.dot_dimension_numbers<[1], [0], [0], [1], [0, 0, 1, 1], [], []>} : vector<16x32xf32>, vector<32x32xf32>, vector<16x32xf32> -> vector<16x32xf32>
    %60 = vector.broadcast %19 : vector<1x32xf32> to vector<16x32xf32>
    %61 = arith.addf %59, %60 : vector<16x32xf32>
    %cst_61 = arith.constant dense<0.000000e+00> : vector<16x32xf32>
    %62 = tpu.matmul %24, %12, %cst_61 {dimension_numbers = #tpu.dot_dimension_numbers<[1], [0], [0], [1], [0, 0, 1, 1], [], []>} : vector<16x32xf32>, vector<32x32xf32>, vector<16x32xf32> -> vector<16x32xf32>
    %63 = vector.broadcast %20 : vector<1x32xf32> to vector<16x32xf32>
    %64 = arith.addf %62, %63 : vector<16x32xf32>
    %65 = arith.addf %45, %58 : vector<16x32xf32>
    %66 = arith.negf %65 : vector<16x32xf32>
    %67 = math.exp %66 : vector<16x32xf32>
    %cst_62 = arith.constant 1.000000e+00 : f32
    %68 = vector.broadcast %cst_62 : f32 to vector<16x32xf32>
    %69 = arith.addf %68, %67 : vector<16x32xf32>
    %70 = arith.divf %68, %69 : vector<16x32xf32>
    %71 = arith.addf %50, %61 : vector<16x32xf32>
    %72 = arith.negf %71 : vector<16x32xf32>
    %73 = math.exp %72 : vector<16x32xf32>
    %cst_63 = arith.constant 1.000000e+00 : f32
    %74 = vector.broadcast %cst_63 : f32 to vector<16x32xf32>
    %75 = arith.addf %74, %73 : vector<16x32xf32>
    %76 = arith.divf %74, %75 : vector<16x32xf32>
    %77 = arith.mulf %70, %64 : vector<16x32xf32>
    %78 = arith.addf %55, %77 : vector<16x32xf32>
    %79 = math.tanh %78 : vector<16x32xf32>
    %80 = arith.subf %24, %79 : vector<16x32xf32>
    %81 = arith.mulf %76, %80 : vector<16x32xf32>
    %82 = arith.addf %79, %81 : vector<16x32xf32>
    %83 = vector.shape_cast %82 : vector<16x32xf32> to vector<2x8x32xf32>
    %c0_64 = arith.constant 0 : index
    %c0_65 = arith.constant 0 : index
    %c0_66 = arith.constant 0 : index
    %84 = vector.load %arg25[%c0_64, %c0_65, %c0_66] : memref<2x8x32xf32, #tpu.memory_space<vmem>>, vector<2x8x32xf32>
    tpu.vector_store %arg25[%c0_64, %c0_65, %c0_66], %83 {strides = array<i32>} : memref<2x8x32xf32, #tpu.memory_space<vmem>>, vector<2x8x32xf32>,
    return
  }
  func.func @transform_0(%arg0: i32) -> (i32, i32, i32) {
    %c0_i32 = arith.constant 0 : i32
    %c0_i32_0 = arith.constant 0 : i32
    %c0_i32_1 = arith.constant 0 : i32
    return %arg0, %c0_i32, %c0_i32_0 : i32, i32, i32
  }
  func.func @transform_1(%arg0: i32) -> (i32, i32, i32) {
    %c0_i32 = arith.constant 0 : i32
    %c0_i32_0 = arith.constant 0 : i32
    %c0_i32_1 = arith.constant 0 : i32
    return %arg0, %c0_i32, %c0_i32_0 : i32, i32, i32
  }
  func.func @transform_2(%arg0: i32) -> (i32, i32, i32) {
    %c0_i32 = arith.constant 0 : i32
    %c0_i32_0 = arith.constant 0 : i32
    %c0_i32_1 = arith.constant 0 : i32
    return %arg0, %c0_i32, %c0_i32_0 : i32, i32, i32
  }
  func.func @transform_3(%arg0: i32) -> (i32, i32) {
    %c0_i32 = arith.constant 0 : i32
    %c0_i32_0 = arith.constant 0 : i32
    %c0_i32_1 = arith.constant 0 : i32
    return %c0_i32, %c0_i32_0 : i32, i32
  }
  func.func @transform_4(%arg0: i32) -> (i32, i32) {
    %c0_i32 = arith.constant 0 : i32
    %c0_i32_0 = arith.constant 0 : i32
    %c0_i32_1 = arith.constant 0 : i32
    return %c0_i32, %c0_i32_0 : i32, i32
  }
  func.func @transform_5(%arg0: i32) -> (i32, i32) {
    %c0_i32 = arith.constant 0 : i32
    %c0_i32_0 = arith.constant 0 : i32
    %c0_i32_1 = arith.constant 0 : i32
    return %c0_i32, %c0_i32_0 : i32, i32
  }
  func.func @transform_6(%arg0: i32) -> (i32, i32) {
    %c0_i32 = arith.constant 0 : i32
    %c0_i32_0 = arith.constant 0 : i32
    %c0_i32_1 = arith.constant 0 : i32
    return %c0_i32, %c0_i32_0 : i32, i32
  }
  func.func @transform_7(%arg0: i32) -> (i32, i32) {
    %c0_i32 = arith.constant 0 : i32
    %c0_i32_0 = arith.constant 0 : i32
    %c0_i32_1 = arith.constant 0 : i32
    return %c0_i32, %c0_i32_0 : i32, i32
  }
  func.func @transform_8(%arg0: i32) -> (i32, i32) {
    %c0_i32 = arith.constant 0 : i32
    %c0_i32_0 = arith.constant 0 : i32
    %c0_i32_1 = arith.constant 0 : i32
    return %c0_i32, %c0_i32_0 : i32, i32
  }
  func.func @transform_9(%arg0: i32) -> (i32, i32) {
    %c0_i32 = arith.constant 0 : i32
    %c0_i32_0 = arith.constant 0 : i32
    %c0_i32_1 = arith.constant 0 : i32
    return %c0_i32, %c0_i32_0 : i32, i32
  }
  func.func @transform_10(%arg0: i32) -> (i32, i32) {
    %c0_i32 = arith.constant 0 : i32
    %c0_i32_0 = arith.constant 0 : i32
    %c0_i32_1 = arith.constant 0 : i32
    return %c0_i32, %c0_i32_0 : i32, i32
  }
  func.func @transform_11(%arg0: i32) -> (i32, i32) {
    %c0_i32 = arith.constant 0 : i32
    %c0_i32_0 = arith.constant 0 : i32
    %c0_i32_1 = arith.constant 0 : i32
    return %c0_i32, %c0_i32_0 : i32, i32
  }
  func.func @transform_12(%arg0: i32) -> (i32, i32) {
    %c0_i32 = arith.constant 0 : i32
    %c0_i32_0 = arith.constant 0 : i32
    %c0_i32_1 = arith.constant 0 : i32
    return %c0_i32, %c0_i32_0 : i32, i32
  }
  func.func @transform_13(%arg0: i32) -> (i32, i32) {
    %c0_i32 = arith.constant 0 : i32
    %c0_i32_0 = arith.constant 0 : i32
    %c0_i32_1 = arith.constant 0 : i32
    return %c0_i32, %c0_i32_0 : i32, i32
  }
  func.func @transform_14(%arg0: i32) -> (i32, i32) {
    %c0_i32 = arith.constant 0 : i32
    %c0_i32_0 = arith.constant 0 : i32
    %c0_i32_1 = arith.constant 0 : i32
    return %c0_i32, %c0_i32_0 : i32, i32
  }
  func.func @transform_15(%arg0: i32) -> (i32, i32) {
    %c0_i32 = arith.constant 0 : i32
    %c0_i32_0 = arith.constant 0 : i32
    %c0_i32_1 = arith.constant 0 : i32
    return %c0_i32, %c0_i32_0 : i32, i32
  }
  func.func @transform_16(%arg0: i32) -> (i32, i32) {
    %c0_i32 = arith.constant 0 : i32
    %c0_i32_0 = arith.constant 0 : i32
    %c0_i32_1 = arith.constant 0 : i32
    return %c0_i32, %c0_i32_0 : i32, i32
  }
  func.func @transform_17(%arg0: i32) -> (i32, i32) {
    %c0_i32 = arith.constant 0 : i32
    %c0_i32_0 = arith.constant 0 : i32
    %c0_i32_1 = arith.constant 0 : i32
    return %c0_i32, %c0_i32_0 : i32, i32
  }
  func.func @transform_18(%arg0: i32) -> (i32, i32) {
    %c0_i32 = arith.constant 0 : i32
    %c0_i32_0 = arith.constant 0 : i32
    %c0_i32_1 = arith.constant 0 : i32
    return %c0_i32, %c0_i32_0 : i32, i32
  }
  func.func @transform_19(%arg0: i32) -> (i32, i32) {
    %c0_i32 = arith.constant 0 : i32
    %c0_i32_0 = arith.constant 0 : i32
    %c0_i32_1 = arith.constant 0 : i32
    return %c0_i32, %c0_i32_0 : i32, i32
  }
  func.func @transform_20(%arg0: i32) -> (i32, i32) {
    %c0_i32 = arith.constant 0 : i32
    %c0_i32_0 = arith.constant 0 : i32
    %c0_i32_1 = arith.constant 0 : i32
    return %c0_i32, %c0_i32_0 : i32, i32
  }
  func.func @transform_21(%arg0: i32) -> (i32, i32) {
    %c0_i32 = arith.constant 0 : i32
    %c0_i32_0 = arith.constant 0 : i32
    %c0_i32_1 = arith.constant 0 : i32
    return %c0_i32, %c0_i32_0 : i32, i32
  }
  func.func @transform_22(%arg0: i32) -> (i32, i32) {
    %c0_i32 = arith.constant 0 : i32
    %c0_i32_0 = arith.constant 0 : i32
    %c0_i32_1 = arith.constant 0 : i32
    return %c0_i32, %c0_i32_0 : i32, i32
  }
  func.func @transform_23(%arg0: i32) -> (i32, i32) {
    %c0_i32 = arith.constant 0 : i32
    %c0_i32_0 = arith.constant 0 : i32
    %c0_i32_1 = arith.constant 0 : i32
    return %c0_i32, %c0_i32_0 : i32, i32
  }
  func.func @transform_24(%arg0: i32) -> (i32, i32, i32) {
    %c0_i32 = arith.constant 0 : i32
    %c0_i32_0 = arith.constant 0 : i32
    %c0_i32_1 = arith.constant 0 : i32
    return %arg0, %c0_i32, %c0_i32_0 : i32, i32, i32
  }
}

</mosaic_0001>

<bundles_post_ra>
// kernel: tpu_custom_call.1
= control target key start
LH: loop header
LB: loop body
LE: loop exit
PB: predicated region body
PF: predicated region fallthrough
CT: control target
= control target key end

     0   :  { %s2525_s0 = inlined_call_operand.hbm [shape: f32[2,8,8], index: 0, kind: input, shape index: {}]   ;;  %s2526_s1 = inlined_call_operand.hbm [shape: f32[2,8,8], index: 1, kind: input, shape index: {}]   ;;  %s2527_s2 = inlined_call_operand.hbm [shape: f32[2,8,32], index: 2, kind: input, shape index: {}]   ;;  %s2528_s3 = inlined_call_operand.hbm [shape: f32[32,32], index: 3, kind: input, shape index: {}]   ;;  %s2529_s4 = inlined_call_operand.vmem [shape: f32[1,32], index: 4, kind: input, shape index: {}]   ;;  %s2530_s5 = inlined_call_operand.hbm [shape: f32[32,32], index: 5, kind: input, shape index: {}]   ;;  %s2531_s6 = inlined_call_operand.vmem [shape: f32[1,32], index: 6, kind: input, shape index: {}]   ;;  %s2532_s7 = inlined_call_operand.hbm [shape: f32[32,32], index: 7, kind: input, shape index: {}]   ;;  %s2533_s8 = inlined_call_operand.hbm [shape: f32[32,32], index: 8, kind: input, shape index: {}]   ;;  %s2534_s9 = inlined_call_operand.hbm [shape: f32[32,32], index: 9, kind: input, shape index: {}]   ;;  %s2535_s10 = inlined_call_operand.hbm [shape: f32[32,32], index: 10, kind: input, shape index: {}]   ;;  %s2536_s11 = inlined_call_operand.hbm [shape: f32[32,32], index: 11, kind: input, shape index: {}]   ;;  %s2537_s12 = inlined_call_operand.hbm [shape: f32[32,32], index: 12, kind: input, shape index: {}]   ;;  %s2538_s13 = inlined_call_operand.hbm [shape: f32[32,32], index: 13, kind: input, shape index: {}]   ;;  %s2539_s14 = inlined_call_operand.hbm [shape: f32[32,32], index: 14, kind: input, shape index: {}]   ;;  %s2540_s15 = inlined_call_operand.hbm [shape: f32[32,32], index: 15, kind: input, shape index: {}]   ;;  %s2541_s16 = inlined_call_operand.vmem [shape: f32[1,32], index: 16, kind: input, shape index: {}]   ;;  %s2542_s17 = inlined_call_operand.vmem [shape: f32[1,32], index: 17, kind: input, shape index: {}]   ;;  %s2543_s18 = inlined_call_operand.vmem [shape: f32[1,32], index: 18, kind: input, shape index: {}]   ;;  %s2544_s19 = inlined_call_operand.vmem [shape: f32[1,32], index: 19, kind: input, shape index: {}]   ;;  %s2545_s20 = inlined_call_operand.vmem [shape: f32[1,32], index: 20, kind: input, shape index: {}]   ;;  %s2546_s21 = inlined_call_operand.vmem [shape: f32[1,32], index: 21, kind: input, shape index: {}]   ;;  %s2547_s22 = inlined_call_operand.vmem [shape: f32[1,32], index: 22, kind: input, shape index: {}]   ;;  %s2548_s23 = inlined_call_operand.vmem [shape: f32[1,32], index: 23, kind: input, shape index: {}]   ;;  %s2549_s24 = inlined_call_operand.hbm [shape: f32[2,8,32], index: 24, kind: output, shape index: {}]  }
   0x1   :  { %2550 = sst [smem:[#allocation35_spill]] %s2525_s0 }
   0x2   :  { %2551 = sst [smem:[#allocation36_spill]] %s2526_s1 }
   0x3   :  { %2552 = sst [smem:[#allocation37_spill]] %s2527_s2 }
   0x4   :  { %2553 = sst [smem:[#allocation38_spill]] %s2528_s3 }
   0x5   :  { %2554 = sst [smem:[#allocation39_spill]] %s2529_s4 }
   0x6   :  { %2555 = sst [smem:[#allocation40_spill]] %s2530_s5 }
   0x7   :  { %2556 = sst [smem:[#allocation41_spill]] %s2531_s6 }
   0x8   :  { %2557 = sst [smem:[#allocation42_spill]] %s2532_s7 }
   0x9   :  { %2558 = sst [smem:[#allocation43_spill]] %s2533_s8 }
   0xa   :  { %29 = vsyncpa [#allocation3], 0 }
   0xb   :  { %30 = vsyncpa [#allocation6], 0 }
   0xc   :  { %31 = vsyncpa [#allocation9], 0 }
   0xd   :  { %32 = vsyncpa [#allocation12], 0 }
   0xe   :  { %33 = vsyncpa [#allocation15], 0 }
   0xf   :  { %34 = vsyncpa [#allocation18], 0 }
  0x10   :  { %35 = vsyncpa [#allocation21], 0 }
  0x11   :  { %36 = vsyncpa [#allocation24], 0 }
  0x12   :  { %37 = vsyncpa [#allocation4], 0  ;;  %s2213_s5 = smov [#allocation5]   ;;  %s2214_s27 = smov [#allocation8]  }
  0x13   :  { %s55_s26 = sshll.u32 %s2213_s5, 4  ;;  %s79_s28 = sshll.u32 %s2214_s27, 4  ;;  %s56_s26 = int_to_ptr.vmem [resolvable:$true] %s55_s26  ;;  %s80_s28 = int_to_ptr.vmem [resolvable:$true] %s79_s28 }
  0x14   :  { %s1903_s6 = scalar_lea.vmem %s56_s26, 256  ;;  %p1908_p1 = scmp.lt.s32.totalorder %s56_s26, %s56_s26 }
  0x15   :  { %p1904_p0 = scmp.ne.s32.totalorder %s56_s26, %s1903_s6  ;;  %p1909_p2 = scmp.lt.s32.totalorder %s1903_s6, %s1903_s6 }
  0x17   :  { %p1910_p3 = por %p1909_p2, %p1908_p1 }
  0x19   :  { %p1911_p4 = pnand %p1910_p3, %p1904_p0 }
  0x1b   :  { %1914 = shalt.err (!%p1911_p4)
}
  0x1c   :  { %s2215_s2 = smov 128   ;;  %s2216_s29 = smov 8  }
  0x1d   :  { %s2559_s30 = sld [smem:[#allocation36_spill]]  ;;  %s1923_s3 = scalar_lea.vmem %s80_s28, 512 }
  0x1e   :  { %p1924_p5 = scmp.ne.s32.totalorder %s80_s28, %s1923_s3  ;;  %p1928_p6 = scmp.lt.s32.totalorder %s80_s28, %s80_s28 }
  0x1f   :  { %p1929_p7 = scmp.lt.s32.totalorder %s1923_s3, %s1923_s3 }
  0x21   :  { %p1930_p8 = por %p1929_p7, %p1928_p6 }
  0x23   :  { %61 = dma.hbm_to_vmem [thread:$0]  %s2559_s30, 256, %s56_s26, [#allocation6], %s2215_s2, %s2215_s2, %s2216_s29  }
  0x24   :  { %p1931_p9 = pnand %p1930_p8, %p1924_p5 }
  0x26   :  { %1934 = shalt.err (!%p1931_p9)
}
  0x27   :  { %s2560_s4 = sld [smem:[#allocation38_spill]]  ;;  %s2217_s1 = smov [#allocation11]  }
  0x28   :  { %s107_s5 = sshll.u32 %s2217_s1, 4  ;;  %s2218_s27 = smov [#allocation14]   ;;  %s108_s5 = int_to_ptr.vmem [resolvable:$true] %s107_s5 }
  0x29   :  { %s131_s6 = sshll.u32 %s2218_s27, 4  ;;  %s1943_s26 = scalar_lea.vmem %s108_s5, 512  ;;  %s132_s6 = int_to_ptr.vmem [resolvable:$true] %s131_s6 }
  0x2a   :  { %p1944_p10 = scmp.ne.s32.totalorder %s108_s5, %s1943_s26  ;;  %p1948_p11 = scmp.lt.s32.totalorder %s108_s5, %s108_s5 }
  0x2b   :  { %p1949_p12 = scmp.lt.s32.totalorder %s1943_s26, %s1943_s26 }
  0x2d   :  { %85 = dma.hbm_to_vmem [thread:$0]  %s2560_s4, 512, %s80_s28, [#allocation9], %s2215_s2, %s2215_s2, %s2216_s29  }
  0x2e   :  { %p1950_p13 = por %p1949_p12, %p1948_p11 }
  0x30   :  { %p1951_p0 = pnand %p1950_p13, %p1944_p10 }
  0x32   :  { %1954 = shalt.err (!%p1951_p0)
}
  0x33   :  { %s2561_s30 = sld [smem:[#allocation42_spill]]  ;;  %s1963_s28 = scalar_lea.vmem %s132_s6, 512 }
  0x34   :  { %p1964_p1 = scmp.ne.s32.totalorder %s132_s6, %s1963_s28  ;;  %p1968_p2 = scmp.lt.s32.totalorder %s132_s6, %s132_s6 }
  0x35   :  { %p1969_p3 = scmp.lt.s32.totalorder %s1963_s28, %s1963_s28 }
  0x37   :  { %p1970_p4 = por %p1969_p3, %p1968_p2 }
  0x39   :  { %113 = dma.hbm_to_vmem [thread:$0]  %s2561_s30, 512, %s108_s5, [#allocation12], %s2215_s2, %s2215_s2, %s2216_s29  }
  0x3a   :  { %p1971_p5 = pnand %p1970_p4, %p1964_p1 }
  0x3c   :  { %1974 = shalt.err (!%p1971_p5)
}
  0x3d   :  { %137 = dma.hbm_to_vmem [thread:$0]  %s2534_s9, 512, %s132_s6, [#allocation15], %s2215_s2, %s2215_s2, %s2216_s29  }
  0x3e   :  { %s2219_s8 = smov [#allocation17]   ;;  %s2220_s1 = smov [#allocation20]  }
  0x3f   :  { %s155_s4 = sshll.u32 %s2219_s8, 4  ;;  %s179_s27 = sshll.u32 %s2220_s1, 4  ;;  %s156_s4 = int_to_ptr.vmem [resolvable:$true] %s155_s4  ;;  %s180_s27 = int_to_ptr.vmem [resolvable:$true] %s179_s27 }
  0x40   :  { %s1983_s5 = scalar_lea.vmem %s156_s4, 512  ;;  %p1988_p7 = scmp.lt.s32.totalorder %s156_s4, %s156_s4 }
  0x41   :  { %p1984_p6 = scmp.ne.s32.totalorder %s156_s4, %s1983_s5  ;;  %p1989_p8 = scmp.lt.s32.totalorder %s1983_s5, %s1983_s5 }
  0x43   :  { %p1990_p9 = por %p1989_p8, %p1988_p7 }
  0x45   :  { %p1991_p10 = pnand %p1990_p9, %p1984_p6 }
  0x47   :  { %1994 = shalt.err (!%p1991_p10)
}
  0x48   :  { %161 = dma.hbm_to_vmem [thread:$0]  %s2536_s11, 512, %s156_s4, [#allocation18], %s2215_s2, %s2215_s2, %s2216_s29  }
  0x49   :  { %s2003_s9 = scalar_lea.vmem %s180_s27, 512  ;;  %p2008_p12 = scmp.lt.s32.totalorder %s180_s27, %s180_s27 }
  0x4a   :  { %p2004_p11 = scmp.ne.s32.totalorder %s180_s27, %s2003_s9  ;;  %p2009_p13 = scmp.lt.s32.totalorder %s2003_s9, %s2003_s9 }
  0x4c   :  { %p2010_p0 = por %p2009_p13, %p2008_p12 }
  0x4e   :  { %p2011_p1 = pnand %p2010_p0, %p2004_p11 }
  0x50   :  { %2014 = shalt.err (!%p2011_p1)
}
  0x51   :  { %185 = dma.hbm_to_vmem [thread:$0]  %s2538_s13, 512, %s180_s27, [#allocation21], %s2215_s2, %s2215_s2, %s2216_s29  }
  0x52   :  { %s2221_s30 = smov [#allocation2]   ;;  %s2222_s3 = smov [#allocation7]  }
  0x53   :  { %s43_s28 = sshll.u32 %s2221_s30, 4  ;;  %s67_s25 = sshll.u32 %s2222_s3, 4  ;;  %s44_s28 = int_to_ptr.vmem [resolvable:$true] %s43_s28  ;;  %s68_s25 = int_to_ptr.vmem [resolvable:$true] %s67_s25 }
  0x54   :  { %s2023_s11 = scalar_lea.vmem %s44_s28, 256  ;;  %p2028_p3 = scmp.lt.s32.totalorder %s44_s28, %s44_s28 }
  0x55   :  { %p2024_p2 = scmp.ne.s32.totalorder %s44_s28, %s2023_s11  ;;  %p2029_p4 = scmp.lt.s32.totalorder %s2023_s11, %s2023_s11 }
  0x57   :  { %p2030_p5 = por %p2029_p4, %p2028_p3 }
  0x59   :  { %p2031_p6 = pnand %p2030_p5, %p2024_p2 }
  0x5b   :  { %2034 = shalt.err (!%p2031_p6)
}
  0x5c   :  { %s2562_s1 = sld [smem:[#allocation35_spill]]  ;;  %s2043_s13 = scalar_lea.vmem %s68_s25, 256 }
  0x5d   :  { %p2044_p7 = scmp.ne.s32.totalorder %s68_s25, %s2043_s13  ;;  %p2048_p8 = scmp.lt.s32.totalorder %s68_s25, %s68_s25 }
  0x5e   :  { %p2049_p9 = scmp.lt.s32.totalorder %s2043_s13, %s2043_s13 }
  0x60   :  { %p2050_p10 = por %p2049_p9, %p2048_p8 }
  0x62   :  { %49 = dma.hbm_to_vmem [thread:$0]  %s2562_s1, 256, %s44_s28, [#allocation3], %s2215_s2, %s2215_s2, %s2216_s29  }
  0x63   :  { %p2051_p11 = pnand %p2050_p10, %p2044_p7 }
  0x65   :  { %2054 = shalt.err (!%p2051_p11)
}
  0x66   :  { %s2563_s26 = sld [smem:[#allocation37_spill]]  ;;  %s2223_s0 = smov [#allocation10]  }
  0x67   :  { %s93_s9 = sshll.u32 %s2223_s0, 4  ;;  %s2224_s6 = smov [#allocation13]   ;;  %s94_s9 = int_to_ptr.vmem [resolvable:$true] %s93_s9 }
  0x68   :  { %s119_s7 = sshll.u32 %s2224_s6, 4  ;;  %s2063_s30 = scalar_lea.vmem %s94_s9, 512  ;;  %s120_s7 = int_to_ptr.vmem [resolvable:$true] %s119_s7 }
  0x69   :  { %p2064_p12 = scmp.ne.s32.totalorder %s94_s9, %s2063_s30  ;;  %p2068_p13 = scmp.lt.s32.totalorder %s94_s9, %s94_s9 }
  0x6a   :  { %p2069_p0 = scmp.lt.s32.totalorder %s2063_s30, %s2063_s30 }
  0x6c   :  { %73 = dma.hbm_to_vmem [thread:$0]  %s2563_s26, 256, %s68_s25, [#allocation6], %s2215_s2, %s2215_s2, %s2216_s29  }
  0x6d   :  { %p2070_p1 = por %p2069_p0, %p2068_p13 }
  0x6f   :  { %p2071_p2 = pnand %p2070_p1, %p2064_p12 }
  0x71   :  { %2074 = shalt.err (!%p2071_p2)
}
  0x72   :  { %s2564_s11 = sld [smem:[#allocation40_spill]]  ;;  %s2083_s25 = scalar_lea.vmem %s120_s7, 512 }
  0x73   :  { %p2084_p3 = scmp.ne.s32.totalorder %s120_s7, %s2083_s25  ;;  %p2088_p4 = scmp.lt.s32.totalorder %s120_s7, %s120_s7 }
  0x74   :  { %p2089_p5 = scmp.lt.s32.totalorder %s2083_s25, %s2083_s25 }
  0x76   :  { %p2090_p6 = por %p2089_p5, %p2088_p4 }
  0x78   :  { %99 = dma.hbm_to_vmem [thread:$0]  %s2564_s11, 512, %s94_s9, [#allocation9], %s2215_s2, %s2215_s2, %s2216_s29  }
  0x79   :  { %p2091_p7 = pnand %p2090_p6, %p2084_p3 }
  0x7b   :  { %2094 = shalt.err (!%p2091_p7)
}
  0x7c   :  { %s2565_s1 = sld [smem:[#allocation43_spill]]  ;;  %s2225_s13 = smov [#allocation16]  }
  0x7d   :  { %s143_s27 = sshll.u32 %s2225_s13, 4  ;;  %s2226_s5 = smov [#allocation19]   ;;  %s144_s27 = int_to_ptr.vmem [resolvable:$true] %s143_s27 }
  0x7e   :  { %s167_s26 = sshll.u32 %s2226_s5, 4  ;;  %s2103_s0 = scalar_lea.vmem %s144_s27, 512  ;;  %s168_s26 = int_to_ptr.vmem [resolvable:$true] %s167_s26 }
  0x7f   :  { %p2104_p8 = scmp.ne.s32.totalorder %s144_s27, %s2103_s0  ;;  %p2108_p9 = scmp.lt.s32.totalorder %s144_s27, %s144_s27 }
  0x80   :  { %p2109_p10 = scmp.lt.s32.totalorder %s2103_s0, %s2103_s0 }
  0x82   :  { %125 = dma.hbm_to_vmem [thread:$0]  %s2565_s1, 512, %s120_s7, [#allocation12], %s2215_s2, %s2215_s2, %s2216_s29  }
  0x83   :  { %p2110_p11 = por %p2109_p10, %p2108_p9 }
  0x85   :  { %p2111_p12 = pnand %p2110_p11, %p2104_p8 }
  0x87   :  { %2114 = shalt.err (!%p2111_p12)
}
  0x88   :  { %149 = dma.hbm_to_vmem [thread:$0]  %s2535_s10, 512, %s144_s27, [#allocation15], %s2215_s2, %s2215_s2, %s2216_s29  }
  0x89   :  { %s2123_s7 = scalar_lea.vmem %s168_s26, 512  ;;  %p2128_p0 = scmp.lt.s32.totalorder %s168_s26, %s168_s26 }
  0x8a   :  { %p2124_p13 = scmp.ne.s32.totalorder %s168_s26, %s2123_s7  ;;  %p2129_p1 = scmp.lt.s32.totalorder %s2123_s7, %s2123_s7 }
  0x8c   :  { %p2130_p2 = por %p2129_p1, %p2128_p0 }
  0x8e   :  { %p2131_p3 = pnand %p2130_p2, %p2124_p13 }
  0x90   :  { %2134 = shalt.err (!%p2131_p3)
}
  0x91   :  { %173 = dma.hbm_to_vmem [thread:$0]  %s2537_s12, 512, %s168_s26, [#allocation18], %s2215_s2, %s2215_s2, %s2216_s29  }
  0x92   :  { %s2227_s3 = smov [#allocation22]   ;;  %s2228_s25 = smov [#allocation23]  }
  0x93   :  { %s191_s11 = sshll.u32 %s2227_s3, 4  ;;  %s203_s8 = sshll.u32 %s2228_s25, 4  ;;  %s192_s11 = int_to_ptr.vmem [resolvable:$true] %s191_s11  ;;  %s204_s8 = int_to_ptr.vmem [resolvable:$true] %s203_s8 }
  0x94   :  { %s2143_s10 = scalar_lea.vmem %s192_s11, 512  ;;  %p2148_p5 = scmp.lt.s32.totalorder %s192_s11, %s192_s11 }
  0x95   :  { %p2144_p4 = scmp.ne.s32.totalorder %s192_s11, %s2143_s10  ;;  %p2149_p6 = scmp.lt.s32.totalorder %s2143_s10, %s2143_s10 }
  0x97   :  { %p2150_p7 = por %p2149_p6, %p2148_p5 }
  0x99   :  { %p2151_p8 = pnand %p2150_p7, %p2144_p4 }
  0x9b   :  { %2154 = shalt.err (!%p2151_p8)
}
  0x9c   :  { %197 = dma.hbm_to_vmem [thread:$0]  %s2539_s14, 512, %s192_s11, [#allocation21], %s2215_s2, %s2215_s2, %s2216_s29  }
  0x9d   :  { %s2163_s12 = scalar_lea.vmem %s204_s8, 512  ;;  %p2168_p10 = scmp.lt.s32.totalorder %s204_s8, %s204_s8 }
  0x9e   :  { %p2164_p9 = scmp.ne.s32.totalorder %s204_s8, %s2163_s12  ;;  %p2169_p11 = scmp.lt.s32.totalorder %s2163_s12, %s2163_s12 }
  0xa0   :  { %p2170_p12 = por %p2169_p11, %p2168_p10 }
  0xa2   :  { %p2171_p13 = pnand %p2170_p12, %p2164_p9 }
  0xa4   :  { %2174 = shalt.err (!%p2171_p13)
}
  0xa5   :  { %209 = dma.hbm_to_vmem [thread:$0]  %s2540_s15, 512, %s204_s8, [#allocation24], %s2215_s2, %s2215_s2, %s2216_s29  }
  0xa6   :  { %2195 = dma.done.wait [#allocation3], 256  }
  0xa7   :  { %2196 = vsyncadd [#allocation3], 4294967040 }
  0xa8   :  { %2197 = dma.done.wait [#allocation6], 512  }
  0xa9   :  { %2198 = vsyncadd [#allocation6], 4294966784 }
  0xaa   :  { %2199 = dma.done.wait [#allocation9], 1024  }
  0xab   :  { %2200 = vsyncadd [#allocation9], 4294966272 }
  0xac   :  { %2201 = dma.done.wait [#allocation12], 1024  }
  0xad   :  { %2202 = vsyncadd [#allocation12], 4294966272 }
  0xae   :  { %2203 = dma.done.wait [#allocation15], 1024  }
  0xaf   :  { %2204 = vsyncadd [#allocation15], 4294966272 }
  0xb0   :  { %2205 = dma.done.wait [#allocation18], 1024  }
  0xb1   :  { %2206 = vsyncadd [#allocation18], 4294966272 }
  0xb2   :  { %2207 = dma.done.wait [#allocation21], 1024  }
  0xb3   :  { %2208 = vsyncadd [#allocation21], 4294966272 }
  0xb4   :  { %2209 = dma.done.wait [#allocation24], 512  }
  0xb5   :  { %2210 = vsyncadd [#allocation24], 4294966784  ;;  %v275_v0 = vld [vmem:[#allocation8 + $0x18] sm:$0xff]  ;;  %v274_v1 = vld [vmem:[#allocation8 + $0x10] sm:$0xff]  ;;  %vm334_vm0 = vcmask 261120   ;;  %v2229_v10 = vmov 0.0  }
  0xb6   :  { %1715 = vmatprep.subr.mxu0 %v275_v0  ;;  %v279_v2 = vld [vmem:[#allocation10 + $0x18] sm:$0xff]  ;;  %v2441_v3 = vld [vmem:[#allocation7] sm:$0xff]  ;;  %v273_v4 = vld [vmem:[#allocation8 + $0x8] sm:$0xff]  ;;  %vm2230_vm1 = vmmov 0   ;;  %s2566_s5 = sld [smem:[#allocation39_spill]]  ;;  %vm497_vm2 = vcmask 64512  }
  0xb7   :  { %1716 = vmatpush3.msra.mxu0 %v275_v0  ;;  %1726 = vmatprep.subr.mxu1 %v279_v2  ;;  %v278_v5 = vld [vmem:[#allocation10 + $0x10] sm:$0xff]  ;;  %v272_v6 = vld [vmem:[#allocation8] sm:$0xff]  ;;  %v277_v7 = vld [vmem:[#allocation10 + $0x8] sm:$0xff]  ;;  %s2567_s9 = sld [smem:[#allocation41_spill]] }
  0xb8   :  { %1717 = vmatprep.subr.mxu0 %v274_v1  ;;  %1727 = vmatpush3.msra.mxu1 %v279_v2  ;;  %v2445_v8 = vld [vmem:[#allocation7 + $0x8] sm:$0xff]  ;;  %v276_v9 = vld [vmem:[#allocation10] sm:$0xff]  ;;  %v268_v17 = vld [vmem:[#allocation2] sm:$0xff] }
  0xb9   :  { %1718 = vmatpush3.msra.mxu0 %v274_v1  ;;  %1723 = vmatprep.mubr.msk.f32.mxu0 %vm334_vm0, %v2441_v3  ;;  %v270_v21 = vld [vmem:[#allocation5] sm:$0xff]  ;;  %v269_v23 = vld [vmem:[#allocation2 + $0x8] sm:$0xff]  ;;  %v271_v25 = vld [vmem:[#allocation5 + $0x8] sm:$0xff] }
  0xba   :  { %1719 = vmatprep.subr.mxu0 %v273_v4  ;;  %1728 = vmatprep.subr.mxu1 %v278_v5  ;;  %v283_v24 = vld [vmem:[#allocation11 + $0x18] sm:$0xff]  ;;  %v282_v26 = vld [vmem:[#allocation11 + $0x10] sm:$0xff]  ;;  %v281_v28 = vld [vmem:[#allocation11 + $0x8] sm:$0xff] }
  0xbb   :  { %1720 = vmatpush3.msra.mxu0 %v273_v4  ;;  %1729 = vmatpush3.msra.mxu1 %v278_v5  ;;  %v295_v27 = vld [vmem:[#allocation16 + $0x18] sm:$0xff]  ;;  %v294_v29 = vld [vmem:[#allocation16 + $0x10] sm:$0xff]  ;;  %v280_v30 = vld [vmem:[#allocation11] sm:$0xff] }
  0xbc   :  { %1721 = vmatprep.subr.mxu0 %v272_v6  ;;  %1730 = vmatprep.subr.mxu1 %v277_v7  ;;  %v1601_v12 = vld [vmem:[%s2566_s5] ss:$0 sm:$0xff]  ;;  %v293_v31 = vld [vmem:[#allocation16 + $0x8] sm:$0xff]  ;;  %v287_v32 = vld [vmem:[#allocation13 + $0x18] sm:$0xff] }
  0xbd   :  { %1722 = vmatpush3.msra.mxu0 %v272_v6  ;;  %1731 = vmatpush3.msra.mxu1 %v277_v7  ;;  %v1604_v15 = vld [vmem:[%s2567_s9] ss:$0 sm:$0xff]  ;;  %v292_v33 = vld [vmem:[#allocation16] sm:$0xff]  ;;  %v299_v34 = vld [vmem:[#allocation17 + $0x18] sm:$0xff] }
  0xbe   :  { %1724 = vmatmul.mubr.msk.f32.vlgmr.msra.gmra.mxu0 %vm334_vm0, %v2445_v8  ;;  %1732 = vmatprep.subr.mxu1 %v276_v9  ;;  %v1611_v35 = vld [vmem:[%s2547_s22] ss:$0 sm:$0xff]  ;;  %v285_v48 = vld [vmem:[#allocation13 + $0x8] sm:$0xff]  ;;  %v284_v52 = vld [vmem:[#allocation13] sm:$0xff] }
  0xbf   :  { %1733 = vmatpush3.msra.mxu1 %v276_v9  ;;  %1734 = vmatprep.mubr.msk.f32.mxu1 %vm334_vm0, %v2441_v3  ;;  %v1612_v38 = vld [vmem:[%s2548_s23] ss:$0 sm:$0xff]  ;;  %v297_v53 = vld [vmem:[#allocation17 + $0x8] sm:$0xff]  ;;  %v291_v54 = vld [vmem:[#allocation14 + $0x18] sm:$0xff] }
  0xc0   :  { %1735 = vmatmul.mubr.msk.f32.vlgmr.msra.gmra.mxu1 %vm334_vm0, %v2445_v8  ;;  %1737 = vmatprep.subr.mxu1 %v2229_v10  ;;  %v286_v46 = vld [vmem:[#allocation13 + $0x10] sm:$0xff]  ;;  %v296_v55 = vld [vmem:[#allocation17] sm:$0xff]  ;;  %v303_v57 = vld [vmem:[#allocation19 + $0x18] sm:$0xff] }
  0xc1   :  { %1747 = vmatprep.subr.mxu0 %v2229_v10  ;;  %1739 = vmatprep.mubr.msk.f32.mxu1 %vm2230_vm1, %v2229_v10  ;;  %v298_v51 = vld [vmem:[#allocation17 + $0x10] sm:$0xff]  ;;  %v289_v58 = vld [vmem:[#allocation14 + $0x8] sm:$0xff]  ;;  %v288_v60 = vld [vmem:[#allocation14] sm:$0xff] }
  0xc2   :  { %1749 = vmatprep.mubr.msk.f32.mxu0 %vm2230_vm1, %v2229_v10  ;;  %v290_v56 = vld [vmem:[#allocation14 + $0x10] sm:$0xff]  ;;  %v301_v61 = vld [vmem:[#allocation19 + $0x8] sm:$0xff]  ;;  %v311_v62 = vld [vmem:[#allocation22 + $0x18] sm:$0xff] }
  0xc3   :  { %v302_v59 = vld [vmem:[#allocation19 + $0x10] sm:$0xff]  ;;  %v300_v63 = vld [vmem:[#allocation19] sm:$0xff]  ;;  %v307_v1 = vld [vmem:[#allocation20 + $0x18] sm:$0xff] }
  0xc4   :  { %v310_v0 = vld [vmem:[#allocation22 + $0x10] sm:$0xff]  ;;  %v309_v2 = vld [vmem:[#allocation22 + $0x8] sm:$0xff]  ;;  %v308_v5 = vld [vmem:[#allocation22] sm:$0xff] }
  0xc5   :  { %v306_v4 = vld [vmem:[#allocation20 + $0x10] sm:$0xff]  ;;  %v305_v6 = vld [vmem:[#allocation20 + $0x8] sm:$0xff]  ;;  %v304_v7 = vld [vmem:[#allocation20] sm:$0xff] }
  0xc6   :  { %v315_v9 = vld [vmem:[#allocation23 + $0x18] sm:$0xff] }
 0x17e   :  { %v1725_v11 = vpop.f32.mrf.mxu0 }
 0x17f   :  { %v413_v19 = vadd.f32 %v1725_v11, %v1601_v12  ;;  %v313_v11 = vld [vmem:[#allocation23 + $0x8] sm:$0xff] }
 0x180   :  { %v407_v13 = vpop.f32.mrf.mxu0  ;;  %v1736_v14 = vpop.f32.mrf.mxu1 }
 0x181   :  { %v408_v16 = vadd.f32 %v1601_v12, %v407_v13  ;;  %v494_v22 = vadd.f32 %v1736_v14, %v1604_v15  ;;  %v312_v12 = vld [vmem:[#allocation23] sm:$0xff] }
 0x182   :  { %v488_v18 = vpop.f32.mrf.mxu1 }
 0x183   :  { %1738 = vmatpush3.msra.mxu1 %v408_v16  ;;  %v489_v20 = vadd.f32 %v1604_v15, %v488_v18 }
 0x184   :  { %1740 = vmatmul.mubr.msk.f32.vlgmr.msra.gmra.mxu1 %vm497_vm2, %v268_v17  ;;  %1742 = vmatprep.subr.mxu1 %v2229_v10 }
 0x185   :  { %1743 = vmatpush3.msra.mxu1 %v413_v19  ;;  %1744 = vmatprep.mubr.msk.f32.mxu1 %vm2230_vm1, %v2229_v10 }
 0x186   :  { %1752 = vmatprep.subr.mxu1 %v2229_v10  ;;  %1748 = vmatpush3.msra.mxu0 %v489_v20 }
 0x187   :  { %1750 = vmatmul.mubr.msk.f32.vlgmr.msra.gmra.mxu0 %vm497_vm2, %v270_v21  ;;  %1757 = vmatprep.subr.mxu0 %v295_v27 }
 0x188   :  { %1745 = vmatmul.mubr.msk.f32.vlgmr.msra.gmra.mxu1 %vm497_vm2, %v269_v23  ;;  %1758 = vmatpush3.msra.mxu0 %v295_v27  ;;  %v1617_v23 = vld [vmem:[%s2541_s16] ss:$0 sm:$0xff] }
 0x189   :  { %1753 = vmatpush3.msra.mxu1 %v494_v22  ;;  %1754 = vmatprep.mubr.msk.f32.mxu1 %vm2230_vm1, %v2229_v10  ;;  %v314_v10 = vld [vmem:[#allocation23 + $0x10] sm:$0xff] }
 0x18a   :  { %1768 = vmatprep.subr.mxu1 %v283_v24  ;;  %1759 = vmatprep.subr.mxu0 %v294_v29 }
 0x18b   :  { %1760 = vmatpush3.msra.mxu0 %v294_v29 }
 0x18c   :  { %1755 = vmatmul.mubr.msk.f32.vlgmr.msra.gmra.mxu1 %vm497_vm2, %v271_v25  ;;  %1761 = vmatprep.subr.mxu0 %v293_v31  ;;  %v1628_v25 = vld [vmem:[%s2544_s19] ss:$0 sm:$0xff] }
 0x18d   :  { %1769 = vmatpush3.msra.mxu1 %v283_v24  ;;  %1762 = vmatpush3.msra.mxu0 %v293_v31 }
 0x18e   :  { %1770 = vmatprep.subr.mxu1 %v282_v26  ;;  %1763 = vmatprep.subr.mxu0 %v292_v33 }
 0x18f   :  { %1771 = vmatpush3.msra.mxu1 %v282_v26  ;;  %1764 = vmatpush3.msra.mxu0 %v292_v33 }
 0x190   :  { %1772 = vmatprep.subr.mxu1 %v281_v28  ;;  %1779 = vmatprep.subr.mxu0 %v299_v34 }
 0x191   :  { %1773 = vmatpush3.msra.mxu1 %v281_v28 }
 0x192   :  { %1774 = vmatprep.subr.mxu1 %v280_v30 }
 0x193   :  { %1775 = vmatpush3.msra.mxu1 %v280_v30 }
 0x194   :  { %1790 = vmatprep.subr.mxu1 %v287_v32 }
 0x244   :  { %v567_v36 = vpop.f32.mrf.mxu1 }
 0x245   :  { %v796_v37 = vadd.f32 %v1611_v35, %v567_v36 }
 0x246   :  { %v1741_v39 = vpop.f32.mrf.mxu1 }
 0x247   :  { %1776 = vmatprep.mubr.msk.f32.mxu1 %vm334_vm0, %v796_v37  ;;  %v713_v40 = vpop.f32.mrf.mxu0  ;;  %v1631_v39 = vld [vmem:[%s2545_s20] ss:$0 sm:$0xff] }
 0x248   :  { %v640_v41 = vpop.f32.mrf.mxu1  ;;  %v804_v42 = vadd.f32 %v1612_v38, %v713_v40 }
 0x249   :  { %v797_v43 = vadd.f32 %v1611_v35, %v640_v41  ;;  %v1751_v44 = vpop.f32.mrf.mxu0 }
 0x24a   :  { %v1746_v45 = vpop.f32.mrf.mxu1  ;;  %1765 = vmatprep.mubr.msk.f32.mxu0 %vm334_vm0, %v804_v42 }
 0x24b   :  { %1777 = vmatmul.mubr.msk.f32.vlgmr.msra.gmra.mxu1 %vm334_vm0, %v797_v43 }
 0x24c   :  { %1791 = vmatpush3.msra.mxu1 %v287_v32  ;;  %v786_v47 = vpop.f32.mrf.mxu1  ;;  %1798 = vmatprep.mubr.msk.f32.mxu1 %vm334_vm0, %v796_v37 }
 0x24d   :  { %v805_v49 = vadd.f32 %v1612_v38, %v786_v47  ;;  %1792 = vmatprep.subr.mxu1 %v286_v46 }
 0x24e   :  { %1793 = vmatpush3.msra.mxu1 %v286_v46  ;;  %v1756_v50 = vpop.f32.mrf.mxu1 }
 0x24f   :  { %1794 = vmatprep.subr.mxu1 %v285_v48  ;;  %1766 = vmatmul.mubr.msk.f32.vlgmr.msra.gmra.mxu0 %vm334_vm0, %v805_v49 }
 0x250   :  { %1780 = vmatpush3.msra.mxu0 %v299_v34  ;;  %1795 = vmatpush3.msra.mxu1 %v285_v48 }
 0x251   :  { %1781 = vmatprep.subr.mxu0 %v298_v51  ;;  %1796 = vmatprep.subr.mxu1 %v284_v52 }
 0x252   :  { %1782 = vmatpush3.msra.mxu0 %v298_v51  ;;  %1787 = vmatprep.mubr.msk.f32.mxu0 %vm334_vm0, %v804_v42 }
 0x253   :  { %1797 = vmatpush3.msra.mxu1 %v284_v52  ;;  %1783 = vmatprep.subr.mxu0 %v297_v53 }
 0x254   :  { %1799 = vmatmul.mubr.msk.f32.vlgmr.msra.gmra.mxu1 %vm334_vm0, %v797_v43  ;;  %1812 = vmatprep.subr.mxu1 %v291_v54 }
 0x255   :  { %1784 = vmatpush3.msra.mxu0 %v297_v53  ;;  %1813 = vmatpush3.msra.mxu1 %v291_v54 }
 0x256   :  { %1820 = vmatprep.mubr.msk.f32.mxu1 %vm334_vm0, %v796_v37  ;;  %1785 = vmatprep.subr.mxu0 %v296_v55 }
 0x257   :  { %1814 = vmatprep.subr.mxu1 %v290_v56  ;;  %1786 = vmatpush3.msra.mxu0 %v296_v55 }
 0x258   :  { %1815 = vmatpush3.msra.mxu1 %v290_v56  ;;  %1788 = vmatmul.mubr.msk.f32.vlgmr.msra.gmra.mxu0 %vm334_vm0, %v805_v49 }
 0x259   :  { %1801 = vmatprep.subr.mxu0 %v303_v57  ;;  %1816 = vmatprep.subr.mxu1 %v289_v58 }
 0x25a   :  { %1802 = vmatpush3.msra.mxu0 %v303_v57  ;;  %1809 = vmatprep.mubr.msk.f32.mxu0 %vm334_vm0, %v804_v42  ;;  %v1622_v42 = vld [vmem:[%s2542_s17] ss:$0 sm:$0xff] }
 0x25b   :  { %1817 = vmatpush3.msra.mxu1 %v289_v58  ;;  %1803 = vmatprep.subr.mxu0 %v302_v59  ;;  %v1634_v58 = vld [vmem:[%s2546_s21] ss:$0 sm:$0xff] }
 0x25c   :  { %1818 = vmatprep.subr.mxu1 %v288_v60  ;;  %1804 = vmatpush3.msra.mxu0 %v302_v59 }
 0x25d   :  { %1819 = vmatpush3.msra.mxu1 %v288_v60  ;;  %1805 = vmatprep.subr.mxu0 %v301_v61 }
 0x25e   :  { %1821 = vmatmul.mubr.msk.f32.vlgmr.msra.gmra.mxu1 %vm334_vm0, %v797_v43  ;;  %1834 = vmatprep.subr.mxu1 %v311_v62 }
 0x25f   :  { %1806 = vmatpush3.msra.mxu0 %v301_v61  ;;  %1835 = vmatpush3.msra.mxu1 %v311_v62  ;;  %v1627_v61 = vld [vmem:[%s2543_s18] ss:$0 sm:$0xff]  ;;  %s2231_s18 = smov [#allocation25]  }
 0x260   :  { %1807 = vmatprep.subr.mxu0 %v300_v63  ;;  %1836 = vmatprep.subr.mxu1 %v310_v0  ;;  %s1582_s21 = sshll.u32 %s2231_s18, 4  ;;  %s1583_s21 = int_to_ptr.vmem [resolvable:$true] %s1582_s21 }
 0x261   :  { %1808 = vmatpush3.msra.mxu0 %v300_v63  ;;  %1837 = vmatpush3.msra.mxu1 %v310_v0  ;;  %s2175_s1 = scalar_lea.vmem %s1583_s21, 256  ;;  %p2180_p1 = scmp.lt.s32.totalorder %s1583_s21, %s1583_s21 }
 0x262   :  { %1810 = vmatmul.mubr.msk.f32.vlgmr.msra.gmra.mxu0 %vm334_vm0, %v805_v49  ;;  %1823 = vmatprep.subr.mxu0 %v307_v1  ;;  %p2176_p0 = scmp.ne.s32.totalorder %s1583_s21, %s2175_s1  ;;  %p2181_p2 = scmp.lt.s32.totalorder %s2175_s1, %s2175_s1 }
 0x263   :  { %1838 = vmatprep.subr.mxu1 %v309_v2  ;;  %1824 = vmatpush3.msra.mxu0 %v307_v1 }
 0x264   :  { %1839 = vmatpush3.msra.mxu1 %v309_v2  ;;  %1825 = vmatprep.subr.mxu0 %v306_v4  ;;  %p2182_p3 = por %p2181_p2, %p2180_p1 }
 0x265   :  { %1840 = vmatprep.subr.mxu1 %v308_v5  ;;  %1826 = vmatpush3.msra.mxu0 %v306_v4 }
 0x266   :  { %1841 = vmatpush3.msra.mxu1 %v308_v5  ;;  %1842 = vmatprep.mubr.msk.f32.mxu1 %vm334_vm0, %v2441_v3  ;;  %p2183_p4 = pnand %p2182_p3, %p2176_p0 }
 0x267   :  { %1827 = vmatprep.subr.mxu0 %v305_v6  ;;  %1843 = vmatmul.mubr.msk.f32.vlgmr.msra.gmra.mxu1 %vm334_vm0, %v2445_v8 }
 0x268   :  { %1828 = vmatpush3.msra.mxu0 %v305_v6  ;;  %1831 = vmatprep.mubr.msk.f32.mxu0 %vm334_vm0, %v2441_v3 }
 0x269   :  { %1829 = vmatprep.subr.mxu0 %v304_v7 }
 0x26a   :  { %1830 = vmatpush3.msra.mxu0 %v304_v7 }
 0x26b   :  { %1832 = vmatmul.mubr.msk.f32.vlgmr.msra.gmra.mxu0 %vm334_vm0, %v2445_v8  ;;  %1845 = vmatprep.subr.mxu0 %v315_v9 }
 0x26c   :  { %1846 = vmatpush3.msra.mxu0 %v315_v9  ;;  %1853 = vmatprep.mubr.msk.f32.mxu0 %vm334_vm0, %v2441_v3 }
 0x26d   :  { %1847 = vmatprep.subr.mxu0 %v314_v10 }
 0x26e   :  { %1848 = vmatpush3.msra.mxu0 %v314_v10 }
 0x26f   :  { %1849 = vmatprep.subr.mxu0 %v313_v11 }
 0x270   :  { %1850 = vmatpush3.msra.mxu0 %v313_v11 }
 0x271   :  { %1851 = vmatprep.subr.mxu0 %v312_v12 }
 0x272   :  { %1852 = vmatpush3.msra.mxu0 %v312_v12 }
 0x273   :  { %1854 = vmatmul.mubr.msk.f32.vlgmr.msra.gmra.mxu0 %vm334_vm0, %v2445_v8 }
 0x30b   :  { %v1778_v15 = vpop.f32.mrf.mxu1 }
 0x30d   :  { %v959_v17 = vpop.f32.mrf.mxu1 }
 0x30f   :  { %v1767_v13 = vpop.f32.mrf.mxu0 }
 0x310   :  { %v965_v21 = vadd.f32 %v1778_v15, %v1767_v13 }
 0x311   :  { %v878_v14 = vpop.f32.mrf.mxu0 }
 0x312   :  { %v960_v26 = vadd.f32 %v959_v17, %v878_v14  ;;  %v975_v29 = vadd.f32 %v1617_v23, %v965_v21 }
 0x314   :  { %v1800_v19 = vpop.f32.mrf.mxu1  ;;  %v974_v32 = vadd.f32 %v1617_v23, %v960_v26 }
 0x316   :  { %v1117_v22 = vpop.f32.mrf.mxu1 }
 0x318   :  { %v1789_v16 = vpop.f32.mrf.mxu0 }
 0x319   :  { %v1123_v41 = vadd.f32 %v1800_v19, %v1789_v16 }
 0x31a   :  { %v1042_v18 = vpop.f32.mrf.mxu0 }
 0x31b   :  { %v1118_v44 = vadd.f32 %v1117_v22, %v1042_v18  ;;  %v1133_v46 = vadd.f32 %v1622_v42, %v1123_v41 }
 0x31d   :  { %v1132_v48 = vadd.f32 %v1622_v42, %v1118_v44 }
 0x31e   :  { %v1822_v27 = vpop.f32.mrf.mxu1 }
 0x320   :  { %v1275_v33 = vpop.f32.mrf.mxu1 }
 0x322   :  { %v1811_v20 = vpop.f32.mrf.mxu0 }
 0x323   :  { %v1281_v59 = vadd.f32 %v1822_v27, %v1811_v20 }
 0x324   :  { %v1200_v24 = vpop.f32.mrf.mxu0 }
 0x325   :  { %v1276_v0 = vadd.f32 %v1275_v33, %v1200_v24  ;;  %v1291_v4 = vadd.f32 %v1627_v61, %v1281_v59 }
 0x327   :  { %v1844_v36 = vpop.f32.mrf.mxu1  ;;  %v1290_v10 = vadd.f32 %v1627_v61, %v1276_v0 }
 0x328   :  { %v1451_v45 = vadd.f32 %v1844_v36, %v1631_v39 }
 0x329   :  { %v1445_v43 = vpop.f32.mrf.mxu1 }
 0x32a   :  { %v1446_v47 = vadd.f32 %v1631_v39, %v1445_v43  ;;  %v1550_v49 = vadd.f32 %v1451_v45, %v1133_v46 }
 0x32b   :  { %v1833_v28 = vpop.f32.mrf.mxu0 }
 0x32c   :  { %v1370_v30 = vadd.f32 %v1833_v28, %v1628_v25  ;;  %v1549_v50 = vadd.f32 %v1446_v47, %v1132_v48  ;;  %v1640_v51 = vmul.f32 -1.442695, %v1550_v49 }
 0x32d   :  { %v1364_v31 = vpop.f32.mrf.mxu0 }
 0x32e   :  { %v1536_v34 = vadd.f32 %v1370_v30, %v975_v29  ;;  %v1365_v35 = vadd.f32 %v1628_v25, %v1364_v31  ;;  %v1639_v53 = vmul.f32 -1.442695, %v1549_v50 }
 0x330   :  { %v1638_v37 = vmul.f32 -1.442695, %v1536_v34  ;;  %v1535_v38 = vadd.f32 %v1365_v35, %v974_v32 }
 0x332   :  { %1875 = vpow2.f32 %v1638_v37  ;;  %v1637_v40 = vmul.f32 -1.442695, %v1535_v38 }
 0x333   :  { %v1855_v57 = vpop.f32.mrf.mxu0 }
 0x334   :  { %1877 = vpow2.f32 %v1637_v40  ;;  %v1532_v60 = vadd.f32 %v1855_v57, %v1634_v58 }
 0x335   :  { %1879 = vpow2.f32 %v1640_v51  ;;  %v1526_v62 = vpop.f32.mrf.mxu0 }
 0x336   :  { %v1527_v6 = vadd.f32 %v1634_v58, %v1526_v62 }
 0x33f   :  { %v1876_v52 = vpop.eup %1875 }
 0x340   :  { %v1544_v54 = vadd.f32 1.0, %v1876_v52 }
 0x341   :  { %v1878_v55 = vpop.eup %1877 }
 0x342   :  { %1881 = vrcp.f32 %v1544_v54  ;;  %v1543_v56 = vadd.f32 1.0, %v1878_v55  ;;  %v1880_v63 = vpop.eup %1879 }
 0x343   :  { %1883 = vpow2.f32 %v1639_v53  ;;  %v1558_v9 = vadd.f32 1.0, %v1880_v63 }
 0x344   :  { %1885 = vrcp.f32 %v1543_v56 }
 0x34f   :  { %v1882_v1 = vpop.eup %1881 }
 0x350   :  { %v1884_v2 = vpop.eup %1883  ;;  %v1564_v5 = vmul.f32 %v1882_v1, %v1532_v60 }
 0x351   :  { %v1886_v7 = vpop.eup %1885  ;;  %v1557_v13 = vadd.f32 1.0, %v1884_v2 }
 0x352   :  { %v1566_v11 = vadd.f32 %v1564_v5, %v1291_v4  ;;  %v1563_v12 = vmul.f32 %v1886_v7, %v1527_v6 }
 0x354   :  { %1887 = vtanh.f32 %v1566_v11  ;;  %v1565_v14 = vadd.f32 %v1563_v12, %v1290_v10 }
 0x355   :  { %1889 = vrcp.f32 %v1558_v9 }
 0x356   :  { %1891 = vtanh.f32 %v1565_v14 }
 0x357   :  { %1893 = vrcp.f32 %v1557_v13 }
 0x361   :  { %v1888_v15 = vpop.eup %1887 }
 0x362   :  { %v1890_v16 = vpop.eup %1889  ;;  %v1570_v17 = vsub.f32 %v2445_v8, %v1888_v15 }
 0x363   :  { %v1892_v18 = vpop.eup %1891 }
 0x364   :  { %v1569_v19 = vsub.f32 %v2441_v3, %v1892_v18  ;;  %v1572_v20 = vmul.f32 %v1890_v16, %v1570_v17  ;;  %v1894_v21 = vpop.eup %1893 }
 0x366   :  { %v1571_v22 = vmul.f32 %v1894_v21, %v1569_v19  ;;  %v1574_v23 = vadd.f32 %v1888_v15, %v1572_v20 }
 0x368   :  { %v1573_v24 = vadd.f32 %v1892_v18, %v1571_v22  ;;  %1576 = vst.msk [vmem:[#allocation25 + $0x8] sm:$0xff] %vm334_vm0, %v1574_v23 }
 0x36a   :  { %1575 = vst.msk [vmem:[#allocation25] sm:$0xff] %vm334_vm0, %v1573_v24 }
 0x36b   :  { %2186 = shalt.err (!%p2183_p4)
}
 0x36c   :  { %1588 = dma.vmem_to_hbm [thread:$0]  %s1583_s21, 256, %s2549_s24, [#allocation4], %s2215_s2, %s2215_s2, %s2216_s29  }
 0x36d   :  { %2211 = dma.done.wait [#allocation4], 256  }
 0x36e   :  { %2212 = vsyncadd [#allocation4], 4294967040 }
 0x36f   :  { %1592 = vsyncpa [#allocation3], 1 }
 0x370   :  { %1593 = vsyncpa [#allocation6], 1 }
 0x371   :  { %1594 = vsyncpa [#allocation9], 1 }
 0x372   :  { %1595 = vsyncpa [#allocation12], 1 }
 0x373   :  { %1596 = vsyncpa [#allocation15], 1 }
 0x374   :  { %1597 = vsyncpa [#allocation18], 1 }
 0x375   :  { %1598 = vsyncpa [#allocation21], 1 }
 0x376   :  { %1599 = vsyncpa [#allocation24], 1 }
 0x377   :  { %1600 = vsyncpa [#allocation4], 1 }

</bundles_post_ra>
